<compile_context>
chip_gen: v6e
topology: v6e:2x2x1
jax: 0.10.0
libtpu: 0.0.40
codegen_flags: <defaults>
</compile_context>

<pallas_src>
import functools

import jax
import jax.numpy as jnp
from jax.experimental import pallas as pl
from jax.experimental.pallas import tpu as pltpu


def _round_up(x: int, m: int) -> int:
    return ((x + m - 1) // m) * m


def _vmem_capacity_bytes() -> int:
    try:
        return int(pltpu.get_tpu_info().vmem_capacity_bytes)
    except Exception:
        return 64 * 1024 * 1024


def _causal_block_kernel(
    # scalar params (SMEM)
    alpha1_ref, alpha2_ref,
    # tensors (VMEM)
    x_ref, w1_ref, b1_ref, wd_ref, bd_ref, wrs_ref, brs_ref,
    # outputs
    res_ref, skip_ref,
    # scratch: persistent feature-halo carry, (H, halo_w + T_TILE) f32
    f_carry,
    *, kernel_size: int, dilation: int, halo_w: int, io_channels: int,
):
    t_idx = pl.program_id(1)
    t_tile = x_ref.shape[-1]
    hidden = f_carry.shape[0]

    # First time-tile of each batch: the halo corresponds to t < 0, where
    # PyTorch left-pads `feature` with zeros.
    @pl.when(t_idx == 0)
    def _():
        f_carry[:, :halo_w] = jnp.zeros((hidden, halo_w), jnp.float32)

    # 1) pointwise conv io -> hidden (bf16 operands on the MXU, f32 accumulate)
    f = jnp.dot(w1_ref[...], x_ref[0], preferred_element_type=jnp.float32)
    f = f + b1_ref[...]                              # (H, t_tile)

    # 2) PReLU (single shared alpha)
    a1 = alpha1_ref[0]
    f = jnp.where(f >= 0, f, a1 * f)

    # stash the current tile's feature next to the carried halo
    f_carry[:, halo_w:] = f

    # 3) depthwise causal conv (groups = hidden).  Taps are static slices of
    #    the carried-and-current feature buffer; accumulator starts as bias.
    #    Kept in f32 (safe on v5e, exact tap accumulation).
    y = jnp.broadcast_to(bd_ref[...], (hidden, t_tile))
    for k in range(kernel_size):
        shift = (kernel_size - 1 - k) * dilation
        if shift == 0:
            tap = f
        else:
            lo = halo_w - shift
            tap = f_carry[:, lo:lo + t_tile]
        y = y + wd_ref[:, k:k + 1] * tap

    # carry the trailing halo_w feature columns into the next time tile
    f_carry[:, :halo_w] = f_carry[:, t_tile:t_tile + halo_w]

    # 4) PReLU
    a2 = alpha2_ref[0]
    y = jnp.where(y >= 0, y, a2 * y)

    # 5+6) residual + skip 1x1 convs fused into one (2*Cio, H) matmul.
    out = jnp.dot(wrs_ref[...], y.astype(jnp.bfloat16),
                  preferred_element_type=jnp.float32) + brs_ref[...]
    res_ref[0] = out[:io_channels].astype(res_ref.dtype)
    skip_ref[0] = out[io_channels:].astype(skip_ref.dtype)


def causal_conv_block(x, params, *, kernel_size: int, dilation: int,
                      t_tile: int = 2048):
    """x: (B, Cio, T) float32.  Returns (residual, skip), each (B, Cio, T)."""
    B, Cio, T = x.shape
    H = params["w1"].shape[0]
    out_dtype = x.dtype

    # Sublane-aligned channel count so the res/skip split and the
    # (1, Cio, T_TILE) blocks stay unmasked.
    Cio_p = _round_up(Cio, 8)

    L = (kernel_size - 1) * dilation              # causal left context
    halo_w = max(128, _round_up(L, 128))          # lane-aligned carry width
    T_TILE = max(128, (t_tile // 128) * 128)      # lane-dense time tile
    T_TILE = min(T_TILE, _round_up(T, 128))
    T_pad = _round_up(T, T_TILE)
    n_t = T_pad // T_TILE

    # Pad channels/time; move the input HBM stream to bf16 (MXU operand).
    pad_c, pad_t = Cio_p - Cio, T_pad - T
    x_p = jnp.pad(x, ((0, 0), (0, pad_c), (0, pad_t))) if (pad_c or pad_t) else x
    x_p = x_p.astype(jnp.bfloat16)

    def pad_out_rows(w):
        return jnp.pad(w, ((0, pad_c), (0, 0))) if pad_c else w

    w1 = params["w1"]
    if pad_c:
        w1 = jnp.pad(w1, ((0, 0), (0, pad_c)))
    w1 = w1.astype(jnp.bfloat16)
    wrs = jnp.concatenate(
        [pad_out_rows(params["wr"]), pad_out_rows(params["ws"])], axis=0
    ).astype(jnp.bfloat16)
    brs = jnp.concatenate(
        [pad_out_rows(params["br"]), pad_out_rows(params["bs"])], axis=0)

    kern = functools.partial(
        _causal_block_kernel, kernel_size=kernel_size, dilation=dilation,
        halo_w=halo_w, io_channels=Cio_p,
    )

    smem_spec = pl.BlockSpec(memory_space=pltpu.MemorySpace.SMEM)

    def fixed(shape):
        return pl.BlockSpec(shape, lambda b, t: (0,) * len(shape))

    x_spec = pl.BlockSpec((1, Cio_p, T_TILE), lambda b, t: (b, 0, t))
    out_spec = pl.BlockSpec((1, Cio_p, T_TILE), lambda b, t: (b, 0, t))

    # Per-step VMEM estimate -> scoped limit, leaving headroom vs. the
    # queried physical capacity (64 MiB on v7x, 128 MiB on v5e/v6e).
    f32, bf16 = 4, 2
    est = (
        H * (halo_w + T_TILE) * f32                  # f-carry scratch
        + 4 * H * T_TILE * f32                       # f / y + temporaries
        + 2 * Cio_p * T_TILE * bf16                  # x tile (double-buffered)
        + 2 * 2 * Cio_p * T_TILE * f32               # res/skip (double-buffered)
        + 2 * (H * Cio_p + 2 * Cio_p * H) * bf16     # matmul weights
        + 4 * H * (kernel_size + 2) * f32            # b1 / wd / bd / brs
    )
    cap = _vmem_capacity_bytes()
    vmem_limit = int(min(max(est, 32 * 1024 * 1024),
                         max(48 * 1024 * 1024, cap - 16 * 1024 * 1024)))

    out_shapes = (
        jax.ShapeDtypeStruct((B, Cio_p, T_pad), out_dtype),   # residual
        jax.ShapeDtypeStruct((B, Cio_p, T_pad), out_dtype),   # skip
    )

    res_p, skip_p = pl.pallas_call(
        kern,
        out_shape=out_shapes,
        grid_spec=pltpu.PrefetchScalarGridSpec(
            num_scalar_prefetch=0,
            grid=(B, n_t),
            in_specs=[
                smem_spec,                       # alpha1
                smem_spec,                       # alpha2
                x_spec,                          # x tile (bf16)
                fixed((H, Cio_p)),               # w1 (bf16)
                fixed((H, 1)),                   # b1
                fixed((H, kernel_size)),         # wd (depthwise)
                fixed((H, 1)),                   # bd
                fixed((2 * Cio_p, H)),           # wr|ws fused (bf16)
                fixed((2 * Cio_p, 1)),           # br|bs fused
            ],
            out_specs=[out_spec, out_spec],
            scratch_shapes=[pltpu.VMEM((H, halo_w + T_TILE), jnp.float32)],
        ),
        compiler_params=pltpu.CompilerParams(
            # Time axis carries the feature halo -> sequential ("arbitrary");
            # batch stays "parallel" for megacore sharding on v7x.
            # TODO(synk): for B == 1 on v7x, split T into two per-core chunks
            # (each with its own zero-initialised halo) to feed both cores.
            dimension_semantics=("parallel", "arbitrary"),
            vmem_limit_bytes=vmem_limit,
        ),
    )(
        params["alpha1"], params["alpha2"],
        x_p,
        w1, params["b1"],
        params["wd"], params["bd"],
        wrs, brs,
    )

    if pad_c or pad_t:
        res_p = res_p[:, :Cio, :T]
        skip_p = skip_p[:, :Cio, :T]
    return res_p, skip_p


def _reference(x, params, *, kernel_size, dilation):
    """Pure-JAX f32 reference mirroring the PyTorch module exactly."""
    B, Cio, T = x.shape
    a1 = params["alpha1"][0]
    a2 = params["alpha2"][0]
    f = jnp.einsum("hc,bct->bht", params["w1"], x) + params["b1"][None]
    f = jnp.where(f >= 0, f, a1 * f)
    L = (kernel_size - 1) * dilation
    fp = jnp.pad(f, ((0, 0), (0, 0), (L, 0)))
    y = jnp.broadcast_to(params["bd"][None], f.shape)
    for k in range(kernel_size):
        y = y + params["wd"][None, :, k:k + 1] * fp[:, :, k * dilation:k * dilation + T]
    y = jnp.where(y >= 0, y, a2 * y)
    res = jnp.einsum("ch,bht->bct", params["wr"], y) + params["br"][None]
    skip = jnp.einsum("ch,bht->bct", params["ws"], y) + params["bs"][None]
    return res, skip


def _make_params(key, Cio, H, kernel_size):
    ks = jax.random.split(key, 8)
    return {
        # PReLU default init in PyTorch is 0.25 (single shared parameter).
        "alpha1": jnp.array([0.25], dtype=jnp.float32),
        "alpha2": jnp.array([0.25], dtype=jnp.float32),
        "w1": jax.random.normal(ks[0], (H, Cio), jnp.float32) * 0.1,
        "b1": jax.random.normal(ks[1], (H, 1), jnp.float32) * 0.1,
        "wd": jax.random.normal(ks[2], (H, kernel_size), jnp.float32) * 0.1,
        "bd": jax.random.normal(ks[3], (H, 1), jnp.float32) * 0.1,
        "wr": jax.random.normal(ks[4], (Cio, H), jnp.float32) * 0.1,
        "br": jax.random.normal(ks[5], (Cio, 1), jnp.float32) * 0.1,
        "ws": jax.random.normal(ks[6], (Cio, H), jnp.float32) * 0.1,
        "bs": jax.random.normal(ks[7], (Cio, 1), jnp.float32) * 0.1,
    }


if __name__ == "__main__":
    key = jax.random.PRNGKey(0)
    kp, kx1, kx2 = jax.random.split(key, 3)

    # Matmul operands run through bf16 (f32 accumulation), so compare with a
    # relaxed tolerance against the f32 reference.
    ATOL = RTOL = 2e-2

    # --- test 1: module-sized small shapes, single time-tile -----------------
    B, Cio, H, T = 2, 4, 32, 16
    kernel_size, dilation = 3, 2
    params = _make_params(kp, Cio, H, kernel_size)
    x = jax.random.normal(kx1, (B, Cio, T), jnp.float32)

    res, skip = causal_conv_block(x, params, kernel_size=kernel_size,
                                  dilation=dilation)
    jax.block_until_ready((res, skip))
    res_ref, skip_ref = _reference(x, params, kernel_size=kernel_size,
                                   dilation=dilation)
    assert jnp.allclose(res, res_ref, atol=ATOL, rtol=RTOL)
    assert jnp.allclose(skip, skip_ref, atol=ATOL, rtol=RTOL)

    # --- test 2: multi-tile path (exercises the carried halo + right padding) -
    T2, dilation2 = 300, 8
    x2 = jax.random.normal(kx2, (B, Cio, T2), jnp.float32)
    res2, skip2 = causal_conv_block(x2, params, kernel_size=kernel_size,
                                    dilation=dilation2, t_tile=128)
    jax.block_until_ready((res2, skip2))
    res2_ref, skip2_ref = _reference(x2, params, kernel_size=kernel_size,
                                     dilation=dilation2)
    assert jnp.allclose(res2, res2_ref, atol=ATOL, rtol=RTOL)
    assert jnp.allclose(skip2, skip2_ref, atol=ATOL, rtol=RTOL)

    # --- test 3: halo wider than the time tile (halo_w > T_TILE carry path) --
    dilation3 = 65   # L = 130 -> halo_w = 256 > T_TILE = 128
    res3, skip3 = causal_conv_block(x2, params, kernel_size=kernel_size,
                                    dilation=dilation3, t_tile=128)
    jax.block_until_ready((res3, skip3))
    res3_ref, skip3_ref = _reference(x2, params, kernel_size=kernel_size,
                                     dilation=dilation3)
    assert jnp.allclose(res3, res3_ref, atol=ATOL, rtol=RTOL)
    assert jnp.allclose(skip3, skip3_ref, atol=ATOL, rtol=RTOL)

    print("KERNEL_OK")
</pallas_src>

<mosaic_0001>
module attributes {stable_mosaic.version = 11 : i64} {
  func.func @_causal_block_kernel(%arg0: i32, %arg1: i32, %arg2: memref<1xf32, #tpu.memory_space<smem>>, %arg3: memref<1xf32, #tpu.memory_space<smem>>, %arg4: memref<1x8x128xbf16, #tpu.memory_space<vmem>>, %arg5: memref<32x8xbf16, #tpu.memory_space<vmem>>, %arg6: memref<32x1xf32, #tpu.memory_space<vmem>>, %arg7: memref<32x3xf32, #tpu.memory_space<vmem>>, %arg8: memref<32x1xf32, #tpu.memory_space<vmem>>, %arg9: memref<16x32xbf16, #tpu.memory_space<vmem>>, %arg10: memref<16x1xf32, #tpu.memory_space<vmem>>, %arg11: memref<1x8x128xf32, #tpu.memory_space<vmem>>, %arg12: memref<1x8x128xf32, #tpu.memory_space<vmem>>, %arg13: memref<32x256xf32, #tpu.memory_space<vmem>>) attributes {dimension_semantics = [#tpu.dimension_semantics<parallel>, #tpu.dimension_semantics<arbitrary>], iteration_bounds = array<i64: 2, 1>, scalar_prefetch = 0 : i64, scratch_operands = 1 : i64, tpu.core_type = #tpu.core_type<tc>, window_params = [{transform_indices = @transform_0, window_bounds = array<i64: 1>}, {transform_indices = @transform_1, window_bounds = array<i64: 1>}, {transform_indices = @transform_2, window_bounds = array<i64: 1, 8, 128>}, {pipeline_mode = #tpu.pipeline_mode<synchronous>, transform_indices = @transform_3, window_bounds = array<i64: 32, 8>}, {pipeline_mode = #tpu.pipeline_mode<synchronous>, transform_indices = @transform_4, window_bounds = array<i64: 32, 1>}, {pipeline_mode = #tpu.pipeline_mode<synchronous>, transform_indices = @transform_5, window_bounds = array<i64: 32, 3>}, {pipeline_mode = #tpu.pipeline_mode<synchronous>, transform_indices = @transform_6, window_bounds = array<i64: 32, 1>}, {pipeline_mode = #tpu.pipeline_mode<synchronous>, transform_indices = @transform_7, window_bounds = array<i64: 16, 32>}, {pipeline_mode = #tpu.pipeline_mode<synchronous>, transform_indices = @transform_8, window_bounds = array<i64: 16, 1>}, {transform_indices = @transform_9, window_bounds = array<i64: 1, 8, 128>}, {transform_indices = @transform_10, window_bounds = array<i64: 1, 8, 128>}]} {
    %c0_i32 = arith.constant 0 : i32
    %0 = arith.cmpi eq, %arg1, %c0_i32 : i32
    %1 = arith.extui %0 : i1 to i32
    %c0_i32_0 = arith.constant 0 : i32
    %2 = arith.cmpi ne, %1, %c0_i32_0 : i32
    scf.if %2 {
      %cst_35 = arith.constant 0.000000e+00 : f32
      %56 = vector.broadcast %cst_35 : f32 to vector<32x128xf32>
      %c0_36 = arith.constant 0 : index
      %c0_37 = arith.constant 0 : index
      %57 = vector.load %arg13[%c0_36, %c0_37] : memref<32x256xf32, #tpu.memory_space<vmem>>, vector<32x128xf32>
      tpu.vector_store %arg13[%c0_36, %c0_37], %56 {strides = array<i32>} : memref<32x256xf32, #tpu.memory_space<vmem>>, vector<32x128xf32>,
    } else {
    }
    %c0 = arith.constant 0 : index
    %c0_1 = arith.constant 0 : index
    %3 = vector.load %arg5[%c0, %c0_1] : memref<32x8xbf16, #tpu.memory_space<vmem>>, vector<32x8xbf16>
    %c0_2 = arith.constant 0 : index
    %c0_3 = arith.constant 0 : index
    %c0_4 = arith.constant 0 : index
    %4 = vector.load %arg4[%c0_2, %c0_3, %c0_4] : memref<1x8x128xbf16, #tpu.memory_space<vmem>>, vector<1x8x128xbf16>
    %5 = vector.shape_cast %4 : vector<1x8x128xbf16> to vector<8x128xbf16>
    %cst = arith.constant dense<0.000000e+00> : vector<32x128xf32>
    %6 = tpu.matmul %3, %5, %cst {dimension_numbers = #tpu.dot_dimension_numbers<[1], [0], [0], [1], [0, 0, 1, 1], [], []>} : vector<32x8xbf16>, vector<8x128xbf16>, vector<32x128xf32> -> vector<32x128xf32>
    %c0_5 = arith.constant 0 : index
    %c0_6 = arith.constant 0 : index
    %7 = vector.load %arg6[%c0_5, %c0_6] : memref<32x1xf32, #tpu.memory_space<vmem>>, vector<32x1xf32>
    %8 = vector.broadcast %7 : vector<32x1xf32> to vector<32x128xf32>
    %9 = arith.addf %6, %8 : vector<32x128xf32>
    %c0_7 = arith.constant 0 : index
    %10 = memref.load %arg2[%c0_7] : memref<1xf32, #tpu.memory_space<smem>>
    %cst_8 = arith.constant 0.000000e+00 : f32
    %11 = vector.broadcast %cst_8 : f32 to vector<32x128xf32>
    %12 = arith.cmpf oge, %9, %11 : vector<32x128xf32>
    %13 = vector.broadcast %10 : f32 to vector<32x128xf32>
    %14 = arith.mulf %13, %9 : vector<32x128xf32>
    %15 = arith.select %12, %9, %14 : vector<32x128xi1>, vector<32x128xf32>
    %c0_9 = arith.constant 0 : index
    %c128 = arith.constant 128 : index
    %16 = vector.load %arg13[%c0_9, %c128] : memref<32x256xf32, #tpu.memory_space<vmem>>, vector<32x128xf32>
    tpu.vector_store %arg13[%c0_9, %c128], %15 {strides = array<i32>} : memref<32x256xf32, #tpu.memory_space<vmem>>, vector<32x128xf32>,
    %c0_10 = arith.constant 0 : index
    %c0_11 = arith.constant 0 : index
    %17 = vector.load %arg8[%c0_10, %c0_11] : memref<32x1xf32, #tpu.memory_space<vmem>>, vector<32x1xf32>
    %18 = vector.shape_cast %17 : vector<32x1xf32> to vector<32x1xf32>
    %19 = vector.broadcast %18 : vector<32x1xf32> to vector<32x128xf32>
    %c0_12 = arith.constant 0 : index
    %c124 = arith.constant 124 : index
    %20 = vector.load %arg13[%c0_12, %c124] : memref<32x256xf32, #tpu.memory_space<vmem>>, vector<32x128xf32>
    %c0_13 = arith.constant 0 : index
    %c0_14 = arith.constant 0 : index
    %21 = vector.load %arg7[%c0_13, %c0_14] : memref<32x3xf32, #tpu.memory_space<vmem>>, vector<32x1xf32>
    %22 = vector.broadcast %21 : vector<32x1xf32> to vector<32x128xf32>
    %23 = arith.mulf %22, %20 : vector<32x128xf32>
    %24 = arith.addf %19, %23 : vector<32x128xf32>
    %c0_15 = arith.constant 0 : index
    %c126 = arith.constant 126 : index
    %25 = vector.load %arg13[%c0_15, %c126] : memref<32x256xf32, #tpu.memory_space<vmem>>, vector<32x128xf32>
    %c0_16 = arith.constant 0 : index
    %c1 = arith.constant 1 : index
    %26 = vector.load %arg7[%c0_16, %c1] : memref<32x3xf32, #tpu.memory_space<vmem>>, vector<32x1xf32>
    %27 = vector.broadcast %26 : vector<32x1xf32> to vector<32x128xf32>
    %28 = arith.mulf %27, %25 : vector<32x128xf32>
    %29 = arith.addf %24, %28 : vector<32x128xf32>
    %c0_17 = arith.constant 0 : index
    %c2 = arith.constant 2 : index
    %30 = vector.load %arg7[%c0_17, %c2] : memref<32x3xf32, #tpu.memory_space<vmem>>, vector<32x1xf32>
    %31 = vector.broadcast %30 : vector<32x1xf32> to vector<32x128xf32>
    %32 = arith.mulf %31, %15 : vector<32x128xf32>
    %33 = arith.addf %29, %32 : vector<32x128xf32>
    %c0_18 = arith.constant 0 : index
    %c128_19 = arith.constant 128 : index
    %34 = vector.load %arg13[%c0_18, %c128_19] : memref<32x256xf32, #tpu.memory_space<vmem>>, vector<32x128xf32>
    %c0_20 = arith.constant 0 : index
    %c0_21 = arith.constant 0 : index
    %35 = vector.load %arg13[%c0_20, %c0_21] : memref<32x256xf32, #tpu.memory_space<vmem>>, vector<32x128xf32>
    tpu.vector_store %arg13[%c0_20, %c0_21], %34 {strides = array<i32>} : memref<32x256xf32, #tpu.memory_space<vmem>>, vector<32x128xf32>,
    %c0_22 = arith.constant 0 : index
    %36 = memref.load %arg3[%c0_22] : memref<1xf32, #tpu.memory_space<smem>>
    %cst_23 = arith.constant 0.000000e+00 : f32
    %37 = vector.broadcast %cst_23 : f32 to vector<32x128xf32>
    %38 = arith.cmpf oge, %33, %37 : vector<32x128xf32>
    %39 = vector.broadcast %36 : f32 to vector<32x128xf32>
    %40 = arith.mulf %39, %33 : vector<32x128xf32>
    %41 = arith.select %38, %33, %40 : vector<32x128xi1>, vector<32x128xf32>
    %c0_24 = arith.constant 0 : index
    %c0_25 = arith.constant 0 : index
    %42 = vector.load %arg9[%c0_24, %c0_25] : memref<16x32xbf16, #tpu.memory_space<vmem>>, vector<16x32xbf16>
    %43 = arith.truncf %41 : vector<32x128xf32> to vector<32x128xbf16>
    %cst_26 = arith.constant dense<0.000000e+00> : vector<16x128xf32>
    %44 = tpu.matmul %42, %43, %cst_26 {dimension_numbers = #tpu.dot_dimension_numbers<[1], [0], [0], [1], [0, 0, 1, 1], [], []>} : vector<16x32xbf16>, vector<32x128xbf16>, vector<16x128xf32> -> vector<16x128xf32>
    %c0_27 = arith.constant 0 : index
    %c0_28 = arith.constant 0 : index
    %45 = vector.load %arg10[%c0_27, %c0_28] : memref<16x1xf32, #tpu.memory_space<vmem>>, vector<16x1xf32>
    %46 = vector.broadcast %45 : vector<16x1xf32> to vector<16x128xf32>
    %47 = arith.addf %44, %46 : vector<16x128xf32>
    %48 = vector.extract_strided_slice %47 {offsets = [0, 0], sizes = [8, 128], strides = [1, 1]} : vector<16x128xf32> to vector<8x128xf32>
    %c0_29 = arith.constant 0 : index
    %c0_30 = arith.constant 0 : index
    %c0_31 = arith.constant 0 : index
    %49 = vector.load %arg11[%c0_29, %c0_30, %c0_31] : memref<1x8x128xf32, #tpu.memory_space<vmem>>, vector<1x8x128xf32>
    %50 = vector.shape_cast %49 : vector<1x8x128xf32> to vector<8x128xf32>
    %51 = vector.shape_cast %48 : vector<8x128xf32> to vector<1x8x128xf32>
    tpu.vector_store %arg11[%c0_29, %c0_30, %c0_31], %51 {strides = array<i32>} : memref<1x8x128xf32, #tpu.memory_space<vmem>>, vector<1x8x128xf32>,
    %52 = vector.extract_strided_slice %47 {offsets = [8, 0], sizes = [8, 128], strides = [1, 1]} : vector<16x128xf32> to vector<8x128xf32>
    %c0_32 = arith.constant 0 : index
    %c0_33 = arith.constant 0 : index
    %c0_34 = arith.constant 0 : index
    %53 = vector.load %arg12[%c0_32, %c0_33, %c0_34] : memref<1x8x128xf32, #tpu.memory_space<vmem>>, vector<1x8x128xf32>
    %54 = vector.shape_cast %53 : vector<1x8x128xf32> to vector<8x128xf32>
    %55 = vector.shape_cast %52 : vector<8x128xf32> to vector<1x8x128xf32>
    tpu.vector_store %arg12[%c0_32, %c0_33, %c0_34], %55 {strides = array<i32>} : memref<1x8x128xf32, #tpu.memory_space<vmem>>, vector<1x8x128xf32>,
    return
  }
  func.func @transform_0(%arg0: i32, %arg1: i32) -> i32 {
    %c0_i32 = arith.constant 0 : i32
    %c0_i32_0 = arith.constant 0 : i32
    return %c0_i32 : i32
  }
  func.func @transform_1(%arg0: i32, %arg1: i32) -> i32 {
    %c0_i32 = arith.constant 0 : i32
    %c0_i32_0 = arith.constant 0 : i32
    return %c0_i32 : i32
  }
  func.func @transform_2(%arg0: i32, %arg1: i32) -> (i32, i32, i32) {
    %c0_i32 = arith.constant 0 : i32
    %c0_i32_0 = arith.constant 0 : i32
    return %arg0, %c0_i32, %arg1 : i32, i32, i32
  }
  func.func @transform_3(%arg0: i32, %arg1: i32) -> (i32, i32) {
    %c0_i32 = arith.constant 0 : i32
    %c0_i32_0 = arith.constant 0 : i32
    %c0_i32_1 = arith.constant 0 : i32
    return %c0_i32, %c0_i32_0 : i32, i32
  }
  func.func @transform_4(%arg0: i32, %arg1: i32) -> (i32, i32) {
    %c0_i32 = arith.constant 0 : i32
    %c0_i32_0 = arith.constant 0 : i32
    %c0_i32_1 = arith.constant 0 : i32
    return %c0_i32, %c0_i32_0 : i32, i32
  }
  func.func @transform_5(%arg0: i32, %arg1: i32) -> (i32, i32) {
    %c0_i32 = arith.constant 0 : i32
    %c0_i32_0 = arith.constant 0 : i32
    %c0_i32_1 = arith.constant 0 : i32
    return %c0_i32, %c0_i32_0 : i32, i32
  }
  func.func @transform_6(%arg0: i32, %arg1: i32) -> (i32, i32) {
    %c0_i32 = arith.constant 0 : i32
    %c0_i32_0 = arith.constant 0 : i32
    %c0_i32_1 = arith.constant 0 : i32
    return %c0_i32, %c0_i32_0 : i32, i32
  }
  func.func @transform_7(%arg0: i32, %arg1: i32) -> (i32, i32) {
    %c0_i32 = arith.constant 0 : i32
    %c0_i32_0 = arith.constant 0 : i32
    %c0_i32_1 = arith.constant 0 : i32
    return %c0_i32, %c0_i32_0 : i32, i32
  }
  func.func @transform_8(%arg0: i32, %arg1: i32) -> (i32, i32) {
    %c0_i32 = arith.constant 0 : i32
    %c0_i32_0 = arith.constant 0 : i32
    %c0_i32_1 = arith.constant 0 : i32
    return %c0_i32, %c0_i32_0 : i32, i32
  }
  func.func @transform_9(%arg0: i32, %arg1: i32) -> (i32, i32, i32) {
    %c0_i32 = arith.constant 0 : i32
    %c0_i32_0 = arith.constant 0 : i32
    return %arg0, %c0_i32, %arg1 : i32, i32, i32
  }
  func.func @transform_10(%arg0: i32, %arg1: i32) -> (i32, i32, i32) {
    %c0_i32 = arith.constant 0 : i32
    %c0_i32_0 = arith.constant 0 : i32
    return %arg0, %c0_i32, %arg1 : i32, i32, i32
  }
}

</mosaic_0001>

<bundles_post_ra>
// kernel: tpu_custom_call.1
= control target key start
LH: loop header
LB: loop body
LE: loop exit
PB: predicated region body
PF: predicated region fallthrough
CT: control target
= control target key end

     0   :  { %s1477_s0 = inlined_call_operand.<no memory space> [shape: f32[1], index: 0, kind: input, shape index: {}]   ;;  %s1478_s1 = inlined_call_operand.<no memory space> [shape: f32[1], index: 1, kind: input, shape index: {}]   ;;  %s1479_s2 = inlined_call_operand.vmem [shape: bf16[2,8,128], index: 2, kind: input, shape index: {}]   ;;  %s1480_s3 = inlined_call_operand.vmem [shape: bf16[32,8], index: 3, kind: input, shape index: {}]   ;;  %s1481_s4 = inlined_call_operand.vmem [shape: f32[32,1], index: 4, kind: input, shape index: {}]   ;;  %s1482_s5 = inlined_call_operand.vmem [shape: f32[32,3], index: 5, kind: input, shape index: {}]   ;;  %s1483_s6 = inlined_call_operand.vmem [shape: f32[32,1], index: 6, kind: input, shape index: {}]   ;;  %s1484_s7 = inlined_call_operand.vmem [shape: bf16[16,32], index: 7, kind: input, shape index: {}]   ;;  %s1485_s8 = inlined_call_operand.vmem [shape: f32[16,1], index: 8, kind: input, shape index: {}]   ;;  %s1486_s9 = inlined_call_operand.hbm [shape: f32[2,8,128], index: 9, kind: output, shape index: {0}]   ;;  %s1487_s10 = inlined_call_operand.hbm [shape: f32[2,8,128], index: 10, kind: output, shape index: {1}]  }
   0x1   :  { %1489 = sst [smem:[#allocation11_spill]] %s1479_s2 }
   0x2   :  { %1490 = sst [smem:[#allocation12_spill]] %s1480_s3 }
   0x3   :  { %16 = sst [smem:[#allocation3]] %s1477_s0 }
   0x4   :  { %17 = sst [smem:[#allocation4]] %s1478_s1 }
   0x5   :  { %18 = vsyncpa [#allocation6], 0 }
   0x6   :  { %20 = vsyncpa [#allocation6 + $0x1], 0 }
   0x7   :  { %21 = vsyncpa [#allocation8], 0 }
   0x8   :  { %23 = vsyncpa [#allocation8 + $0x1], 0  ;;  %s1262_s17 = smov 0   ;;  %s1264_s18 = smov 0  }
   0x9   :  { %s1266_s19 = smov 0   ;;  %s1268_s20 = smov 0  }
   0xa   :  { %s1270_s21 = smov 0   ;;  %s1272_s22 = smov 0  }
   0xb LB: > { %s961_s0 = sadd.s32 4294967295, %s1189_s22   ;;  %s962_s1 = sadd.s32 4294967294, %s1189_s22   ;;  %s1189_s22 = sphi %s1272_s22, %s29_s22   ;;  %s1185_s21 = sphi %s1270_s21, %s1501_s21   ;;  %s1181_s20 = sphi %s1268_s20, %s1500_s20   ;;  %s1177_s19 = sphi %s1266_s19, %s1499_s19   ;;  %s1173_s18 = sphi %s1264_s18, %s1498_s18   ;;  %s1169_s17 = sphi %s1262_s17, %s1497_s17  }
   0xc   : > { %s41_s23 = sadd.s32 1, %s1185_s21  ;;  %s246_s24 = sadd.s32 1, %s1177_s19 }
   0xd   : > { %p43_p0 = scmp.ge.s32.totalorder %s41_s23, 2  ;;  %p256_p1 = scmp.ne.s32.totalorder %s1177_s19, %s1173_s18 }
   0xe   : > { %p257_p2 = scmp.eq.s32.totalorder %s961_s0, 1  ;;  %p262_p3 = scmp.ne.s32.totalorder %s1173_s18, %s1169_s17 }
   0xf   : > { %s1503_s23 = smov (%p43_p0, %s41_s23), 0  ;;  %p263_p5 = scmp.eq.s32.totalorder %s962_s1, 1 }
  0x10   : > { %p1302_p4 = por %p257_p2, %p256_p1  ;;  %s241_s26 = ssub.s32 %s1185_s21, %s1503_s23 }
  0x11   : > { %p965_p6 = scmp.ge.s32.totalorder %s1189_s22, 1  ;;  %p244_p7 = scmp.eq.s32.totalorder %s241_s26, 0 }
  0x12   : > { %p1309_p8 = por %p263_p5, %p262_p3  ;;  %p343_p9 = scmp.lt.s32.totalorder %s1189_s22, 3 }
  0x13   : > { %s1315_s28 = scalar_select %p244_p7, %s1177_s19, %s246_s24  }
  0x14   : > { %p344_p10 = pnand %p965_p6, %p343_p9 }
  0x15   : > { %p388_p11 = scmp.lt.s32.totalorder (!%p344_p10), %s1181_s20, 1  ;;  %s1493_s3 = sld [smem:[#allocation12_spill]] (!%p344_p10) }
  0x16   : > { %347 = sbr.rel (%p344_p10) target bundleno = 729 (0x2d9), region = 56  ;;  %s1494_s2 = sld [smem:[#allocation11_spill]] (!%p344_p10) }
  0x17   : > { %s1194_s1 = smov (!%p344_p10), 126   ;;  %s1195_s26 = smov (!%p344_p10), 124  }
  0x18   : > { %s710_s29 = sld [smem:[#allocation4]] (!%p344_p10)  ;;  %s1198_s30 = smov (!%p344_p10), 4  }
  0x19   : > { %s1391_s0 = sand.u32 (!%p344_p10), 1, %s1173_s18  }
  0x1a   : > { %s824_s15 = scalar_lea.sflag (!%p344_p10), [#allocation6], %s1391_s0 }
  0x1b   : > { %v1080_v0 = vld [vmem:[%s1493_s3] sm:$0xff]   ;;  %vm443_vm0 = vcmask 64512   ;;  %s389_s11 = scalar_select %p388_p11, %s1181_s20, 1  ;;  %v1191_v2 = vmov 0   ;;  %v411_v3 = vld [vmem:[%s1481_s4 + $0x10] sm:$0xff]  ;;  %vm450_vm1 = vcmask 1043456  }
  0x1c   : > { %v409_v1 = vld [vmem:[%s1481_s4] sm:$0xff]  ;;  %989 = vmatprep.mubr.msk.bf16.mxu0 %vm443_vm0, %v1080_v0  ;;  %1071 = vset.pattern.permute.xlu1 %v1191_v2  ;;  %v410_v4 = vld [vmem:[%s1481_s4 + $0x8] sm:$0xff]  ;;  %v412_v6 = vld [vmem:[%s1481_s4 + $0x18] sm:$0xff]  ;;  %v1192_v10 = vmov 1   ;;  %v1193_v12 = vmov 2   ;;  %vm641_vm6 = vcmask 1031168  }
  0x1d   : > { %s968_s16 = sshll.u32 %s389_s11, 2  ;;  %415 = vperm.xlu1 %1071, %v409_v1   ;;  %1070 = vset.pattern.permute.xlu0 %v1191_v2  ;;  %v1081_v8 = vld [vmem:[%s1493_s3 + $0x8] sm:$0xff]   ;;  %v556_v9 = vld [vmem:[%s1482_s5 + $0x18] sm:$0xff]  ;;  %v555_v11 = vld [vmem:[%s1482_s5 + $0x10] sm:$0xff]  ;;  %vm1197_vm11 = vmmov 0  }
  0x1e   : > { %s394_s24 = scalar_lea.vmem %s1494_s2, %s968_s16  ;;  %425 = vperm.xlu0 %1070, %v411_v3   ;;  %v553_v13 = vld [vmem:[%s1482_s5] sm:$0xff]  ;;  %v554_v14 = vld [vmem:[%s1482_s5 + $0x8] sm:$0xff]  ;;  %v524_v15 = vld [vmem:[%s1483_s6 + $0x18] sm:$0xff] }
  0x1f   : > { %v408_v5 = vld [vmem:[%s394_s24] sm:$0xf]  ;;  %v522_v16 = vld [vmem:[%s1483_s6 + $0x8] sm:$0xff]  ;;  %v523_v17 = vld [vmem:[%s1483_s6 + $0x10] sm:$0xff]  ;;  %s503_s24 = sld [smem:[#allocation3]] }
  0x20   : > { %1001 = vmatprep.subr.msk.bf16.mxu0 %vm450_vm1, %v408_v5  ;;  %v452_v7 = vsel %vm450_vm1, %v408_v5, 0  ;;  %v521_v18 = vld [vmem:[%s1483_s6] sm:$0xff]  ;;  %vm776_vm1 = vcmask 261120  }
  0x21   : > { %988 = vmatpush3.bf16.msra.mxu0 %v452_v7  ;;  %420 = vperm.xlu1 %1071, %v410_v4  }
  0x22   : > { %430 = vperm.xlu0 %1070, %v412_v6  }
  0x24   : > { %990 = vmatmul.mubr.msk.bf16.vlgmr.msra.gmra.mxu0 %vm443_vm0, %v1081_v8  ;;  %vm771_vm0 = vcmask 31744  }
  0x25   : > { %1073 = vset.pattern.permute.xlu1 %v1192_v10  ;;  %v508_v33 = vstv %s503_s24  ;;  %s1488_s24 = sshll.u32 %s1181_s20, 7 }
  0x26   : > { %606 = vperm.xlu1 %1073, %v556_v9   ;;  %1072 = vset.pattern.permute.xlu0 %v1192_v10  ;;  %s1400_s11 = scalar_lea.hbm %s1486_s9, %s1488_s24 }
  0x27   : > { %602 = vperm.xlu0 %1072, %v555_v11  }
  0x2a   : > { %1074 = vset.pattern.permute.xlu1 %v1193_v12 }
  0x2b   : > { %671 = vperm.xlu1 %1074, %v555_v11   ;;  %1075 = vset.pattern.permute.xlu0 %v1193_v12 }
  0x2c   : > { %675 = vperm.xlu0 %1075, %v556_v9  }
  0x2f   : > { %1076 = vset.pattern.permute.xlu1 %v1192_v10 }
  0x30   : > { %594 = vperm.xlu1 %1076, %v553_v13   ;;  %663 = vperm.xlu0 %1075, %v553_v13  }
  0x34   : > { %598 = vperm.xlu1 %1076, %v554_v14   ;;  %1078 = vset.pattern.permute.xlu0 %v1191_v2 }
  0x35   : > { %569 = vperm.xlu0 %1078, %v555_v11  }
  0x38   : > { %1077 = vset.pattern.permute.xlu1 %v1193_v12 }
  0x39   : > { %667 = vperm.xlu1 %1077, %v554_v14   ;;  %542 = vperm.xlu0 %1078, %v524_v15  }
  0x3d   : > { %1079 = vset.pattern.permute.xlu1 %v1191_v2  ;;  %564 = vperm.xlu0 %1078, %v554_v14  }
  0x3e   : > { %574 = vperm.xlu1 %1079, %v556_v9  }
  0x41   : > { %532 = vperm.xlu0 %1078, %v522_v16  }
  0x42   : > { %537 = vperm.xlu1 %1079, %v523_v17  }
  0x46   : > { %559 = vperm.xlu1 %1079, %v553_v13  }
  0x4a   : > { %527 = vperm.xlu1 %1079, %v521_v18  }
  0x98   : > { %v416_v19 = vpop.permute.xlu1 %415 }
  0x99   : > { %v426_v20 = vpop.permute.xlu0 %425 }
  0x9c   : > { %v421_v21 = vpop.permute.xlu1 %420 }
  0x9d   : > { %v431_v22 = vpop.permute.xlu0 %430 }
  0xa1   : > { %v607_v23 = vpop.permute.xlu1 %606 }
  0xa2   : > { %v603_v24 = vpop.permute.xlu0 %602  ;;  %v615_v26 = vmul.f32 0.0, %v607_v23 }
  0xa3   : > { %v613_v25 = vmul.f32 0.0, %v603_v24 }
  0xa5   : > { %633 = vrot.lane.b32.xlu1 %v613_v25, %s1194_s1  ;;  %v719_v25 = vstv %s710_s29 }
  0xa6   : > { %v672_v27 = vpop.permute.xlu1 %671 }
  0xa7   : > { %v676_v36 = vpop.permute.xlu0 %675 }
  0xa9   : > { %637 = vrot.lane.b32.xlu1 %v615_v26, %s1194_s1 }
  0xab   : > { %v595_v28 = vpop.permute.xlu1 %594  ;;  %v664_v48 = vpop.permute.xlu0 %663 }
  0xac   : > { %v609_v29 = vmul.f32 0.0, %v595_v28 }
  0xae   : > { %625 = vrot.lane.b32.xlu1 %v609_v29, %s1194_s1 }
  0xaf   : > { %v599_v30 = vpop.permute.xlu1 %598 }
  0xb0   : > { %v611_v31 = vmul.f32 0.0, %v599_v30  ;;  %v570_v63 = vpop.permute.xlu0 %569 }
  0xb1   : > { %v581_v8 = vmul.f32 0.0, %v570_v63 }
  0xb2   : > { %629 = vrot.lane.b32.xlu1 %v611_v31, %s1194_s1 }
  0xb4   : > { %v668_v58 = vpop.permute.xlu1 %667  ;;  %v543_v2 = vpop.permute.xlu0 %542 }
  0xb8   : > { %v565_v4 = vpop.permute.xlu0 %564 }
  0xb9   : > { %v575_v60 = vpop.permute.xlu1 %574 }
  0xba   : > { %v583_v14 = vmul.f32 0.0, %v575_v60 }
  0xbc   : > { %v533_v6 = vpop.permute.xlu0 %532 }
  0xbd   : > { %v538_v61 = vpop.permute.xlu1 %537 }
  0xbe   : > { %v589_v13 = vadd.f32 %v581_v8, %v538_v61 }
  0xc1   : > { %v560_v62 = vpop.permute.xlu1 %559 }
  0xc5   : > { %v528_v0 = vpop.permute.xlu1 %527 }
  0xe4   : > { %v991_v32 = vpop.f32.mrf.mxu0 }
  0xe5   : > { %v497_v34 = vadd.f32 %v991_v32, %v426_v20 }
  0xe6   : > { %v488_v35 = vpop.f32.mrf.mxu0 }
  0xe7   : > { %vm506_vm2 = vcmp.ge.f32.partialorder %v497_v34, 0.0  ;;  %v511_v37 = vmul.f32 %v508_v33, %v497_v34  ;;  %v489_v38 = vadd.f32 %v488_v35, %v416_v19  ;;  %v577_v19 = vmul.f32 0.0, %v560_v62 }
  0xe8   : > { %v992_v39 = vpop.f32.mrf.mxu0 }
  0xe9   : > { %v515_v40 = vsel %vm506_vm2, %v497_v34, %v511_v37  ;;  %vm504_vm3 = vcmp.ge.f32.partialorder %v489_v38, 0.0  ;;  %v509_v41 = vmul.f32 %v508_v33, %v489_v38  ;;  %v500_v42 = vadd.f32 %v992_v39, %v431_v22 }
  0xea   : > { %v680_v43 = vmul.f32 %v672_v27, %v515_v40  ;;  %v614_v44 = vmul.f32 %v603_v24, %v515_v40  ;;  %v491_v47 = vpop.f32.mrf.mxu0  ;;  %v582_v7 = vmul.f32 %v570_v63, %v515_v40  ;;  %v1196_v22 = vmov 0.0  }
  0xeb   : > { %v512_v45 = vmul.f32 %v508_v33, %v500_v42  ;;  %v513_v46 = vsel %vm504_vm3, %v489_v38, %v509_v41  ;;  %vm507_vm4 = vcmp.ge.f32.partialorder %v500_v42, 0.0  ;;  %v492_v52 = vadd.f32 %v491_v47, %v421_v21  ;;  %993 = vmatprep.subr.bf16.mxu1 %v1196_v22  ;;  %997 = vmatprep.mubr.msk.bf16.mxu1 %vm1197_vm11, %v1196_v22 }
  0xec   : > { %690 = vrot.lane.b32.xlu1 %v680_v43, %s1195_s26  ;;  %635 = vrot.lane.b32.xlu0 %v614_v44, %s1194_s1  ;;  %v678_v49 = vmul.f32 %v664_v48, %v513_v46  ;;  %v610_v50 = vmul.f32 %v595_v28, %v513_v46  ;;  %v590_v11 = vadd.f32 %v582_v7, %v538_v61  ;;  %v579_v24 = vmul.f32 0.0, %v565_v4 }
  0xed   : > { %v516_v51 = vsel %vm507_vm4, %v500_v42, %v512_v45  ;;  %v510_v54 = vmul.f32 %v508_v33, %v492_v52  ;;  %vm505_vm5 = vcmp.ge.f32.partialorder %v492_v52, 0.0  ;;  %v578_v20 = vmul.f32 %v560_v62, %v513_v46 }
  0xee   : > { %v616_v53 = vmul.f32 %v607_v23, %v516_v51  ;;  %v681_v55 = vmul.f32 %v676_v36, %v516_v51  ;;  %v584_v17 = vmul.f32 %v575_v60, %v516_v51  ;;  %v591_v23 = vadd.f32 %v583_v14, %v543_v2 }
  0xef   : > { %v514_v56 = vsel %vm505_vm5, %v492_v52, %v510_v54  ;;  %v585_v33 = vadd.f32 %v577_v19, %v528_v0  ;;  %v586_v34 = vadd.f32 %v578_v20, %v528_v0  ;;  %v587_v44 = vadd.f32 %v579_v24, %v533_v6 }
  0xf0   : > { %686 = vrot.lane.b32.xlu1 %v678_v49, %s1195_s26  ;;  %627 = vrot.lane.b32.xlu0 %v610_v50, %s1194_s1  ;;  %v612_v57 = vmul.f32 %v599_v30, %v514_v56  ;;  %v679_v59 = vmul.f32 %v668_v58, %v514_v56  ;;  %v592_v28 = vadd.f32 %v584_v17, %v543_v2 }
  0xf1   : > { %v580_v32 = vmul.f32 %v565_v4, %v514_v56 }
  0xf3   : > { %v588_v45 = vadd.f32 %v580_v32, %v533_v6 }
  0xf4   : > { %639 = vrot.lane.b32.xlu0 %v616_v53, %s1194_s1 }
  0xf8   : > { %692 = vrot.lane.b32.xlu0 %v681_v55, %s1195_s26 }
  0xfc   : > { %631 = vrot.lane.b32.xlu0 %v612_v57, %s1194_s1  ;;  %s966_s1 = sshll.u32 %s1391_s0, 3 }
  0xfd   : > { %s1404_s13 = scalar_lea.vmem [#allocation7], %s966_s1 }
 0x100   : > { %688 = vrot.lane.b32.xlu0 %v679_v59, %s1195_s26  ;;  %s380_s26 = scalar_lea.vmem [#allocation5], %s966_s1 }
 0x101   : > { %s843_s29 = sshll.u32 %s380_s26, 4  ;;  %s1402_s29 = int_to_ptr.vmem [resolvable:$true] %s843_s29 }
 0x102   : > { %s1083_s16 = scalar_lea.vmem %s1402_s29, 128 }
 0x103   : > { %p1084_p12 = scmp.ne.s32.totalorder %s1402_s29, %s1083_s16 }
 0x105   : > { %p1085_p13 = pnand %p1084_p12, %p1302_p4 }
 0x107   : > { %p1086_p0 = pneg %p1085_p13 }
 0x117   : > { %v634_v1 = vpop.permute.xlu1 %633 }
 0x11b   : > { %v638_v3 = vpop.permute.xlu1 %637 }
 0x120   : > { %v626_v5 = vpop.permute.xlu1 %625 }
 0x124   : > { %v630_v10 = vpop.permute.xlu1 %629 }
 0x15e   : > { %v636_v9 = vpop.permute.xlu0 %635  ;;  %v691_v21 = vpop.permute.xlu1 %690 }
 0x15f   : > { %v644_v12 = vsel %vm641_vm6, %v634_v1, %v636_v9  ;;  %v659_v15 = vadd.f32 %v636_v9, %v590_v11  ;;  %v743_v11 = vld [vmem:[%s1485_s8 + $0x8] sm:$0xff] }
 0x160   : > { %v658_v18 = vadd.f32 %v644_v12, %v589_v13 }
 0x161   : > { %v703_v26 = vadd.f32 %v691_v21, %v659_v15 }
 0x162   : > { %v628_v16 = vpop.permute.xlu0 %627  ;;  %v702_v29 = vadd.f32 %v691_v21, %v658_v18  ;;  %v687_v46 = vpop.permute.xlu1 %686  ;;  %v1082_v18 = vld [vmem:[%s1484_s7] sm:$0xff]  }
 0x163   : > { %v642_v30 = vsel %vm641_vm6, %v626_v5, %v628_v16  ;;  %v725_v37 = vmul.f32 %v719_v25, %v703_v26  ;;  %v655_v39 = vadd.f32 %v628_v16, %v586_v34  ;;  %vm716_vm7 = vcmp.ge.f32.partialorder %v703_v26, 0.0 }
 0x164   : > { %v654_v38 = vadd.f32 %v642_v30, %v585_v33  ;;  %v724_v41 = vmul.f32 %v719_v25, %v702_v29  ;;  %vm715_vm8 = vcmp.ge.f32.partialorder %v702_v29, 0.0 }
 0x165   : > { %v699_v50 = vadd.f32 %v687_v46, %v655_v39  ;;  %v733_v52 = vsel %vm716_vm7, %v703_v26, %v725_v37 }
 0x166   : > { %v640_v27 = vpop.permute.xlu0 %639  ;;  %v698_v49 = vadd.f32 %v687_v46, %v654_v38  ;;  %v732_v55 = vsel %vm715_vm8, %v702_v29, %v724_v41 }
 0x167   : > { %v645_v31 = vsel %vm641_vm6, %v638_v3, %v640_v27  ;;  %v661_v36 = vadd.f32 %v640_v27, %v592_v28  ;;  %v721_v63 = vmul.f32 %v719_v25, %v699_v50  ;;  %vm712_vm13 = vcmp.ge.f32.partialorder %v699_v50, 0.0 }
 0x168   : > { %v660_v35 = vadd.f32 %v645_v31, %v591_v23  ;;  %v720_v62 = vmul.f32 %v719_v25, %v698_v49  ;;  %vm711_vm12 = vcmp.ge.f32.partialorder %v698_v49, 0.0 }
 0x169   : > { %v729_v6 = vsel %vm712_vm13, %v699_v50, %v721_v63 }
 0x16a   : > { %v693_v40 = vpop.permute.xlu0 %692  ;;  %v728_v4 = vsel %vm711_vm12, %v698_v49, %v720_v62 }
 0x16b   : > { %v704_v42 = vadd.f32 %v693_v40, %v660_v35  ;;  %v705_v43 = vadd.f32 %v693_v40, %v661_v36 }
 0x16d   : > { %vm717_vm9 = vcmp.ge.f32.partialorder %v704_v42, 0.0  ;;  %vm718_vm10 = vcmp.ge.f32.partialorder %v705_v43, 0.0  ;;  %v726_v47 = vmul.f32 %v719_v25, %v704_v42  ;;  %v727_v48 = vmul.f32 %v719_v25, %v705_v43 }
 0x16e   : > { %v632_v51 = vpop.permute.xlu0 %631 }
 0x16f   : > { %v643_v53 = vsel %vm641_vm6, %v630_v10, %v632_v51  ;;  %v735_v54 = vsel %vm718_vm10, %v705_v43, %v727_v48  ;;  %v734_v56 = vsel %vm717_vm9, %v704_v42, %v726_v47  ;;  %v657_v60 = vadd.f32 %v632_v51, %v588_v45  ;;  %v742_v10 = vld [vmem:[%s1485_s8] sm:$0xff] }
 0x170   : > { %v656_v57 = vadd.f32 %v643_v53, %v587_v44  ;;  %v741_v58 = vpack.c.bf16 %v735_v54, %v733_v52  ;;  %v740_v59 = vpack.c.bf16 %v734_v56, %v732_v55 }
 0x172   : > { %769 = vrot.lane.b32.xlu0 %v741_v58, %s1198_s30  ;;  %767 = vrot.lane.b32.xlu1 %v740_v59, %s1198_s30  ;;  %v689_v61 = vpop.permute.xlu0 %688 }
 0x173   : > { %v700_v0 = vadd.f32 %v689_v61, %v656_v57  ;;  %v701_v1 = vadd.f32 %v689_v61, %v657_v60 }
 0x175   : > { %vm713_vm14 = vcmp.ge.f32.partialorder %v700_v0, 0.0  ;;  %vm714_vm15 = vcmp.ge.f32.partialorder %v701_v1, 0.0  ;;  %v722_v2 = vmul.f32 %v719_v25, %v700_v0  ;;  %v723_v3 = vmul.f32 %v719_v25, %v701_v1 }
 0x177   : > { %v730_v5 = vsel %vm713_vm14, %v700_v0, %v722_v2  ;;  %v731_v7 = vsel %vm714_vm15, %v701_v1, %v723_v3 }
 0x178   : > { %v738_v8 = vpack.c.bf16 %v730_v5, %v728_v4  ;;  %v739_v9 = vpack.c.bf16 %v731_v7, %v729_v6 }
 0x17a   : > { %763 = vrot.lane.b32.xlu1 %v738_v8, %s1198_s30  ;;  %765 = vrot.lane.b32.xlu0 %v739_v9, %s1198_s30  ;;  %s1199_s30 = smov [#allocation5]  }
 0x17b   : > { %s1087_s12 = sshll.u32 %s1199_s30, 4  ;;  %s1088_s12 = int_to_ptr.vmem [resolvable:$false] %s1087_s12 }
 0x17c   : > { %s1089_s24 = scalar_lea.vmem %s1088_s12, 256  ;;  %p1090_p1 = scmp.lt.s32.totalorder %s1402_s29, %s1088_s12 }
 0x17d   : > { %p1091_p2 = scmp.lt.s32.totalorder %s1089_s24, %s1083_s16 }
 0x17e   : > { %746 = vperm.xlu1 %1079, %v742_v10   ;;  %751 = vperm.xlu0 %1078, %v743_v11  }
 0x17f   : > { %p1092_p3 = por %p1091_p2, %p1090_p1 }
 0x181   : > { %p1093_p5 = pnand %p1092_p3, %p1086_p0 }
 0x1e4   : > { %v768_v12 = vpop.permute.xlu1 %767  ;;  %v770_v13 = vpop.permute.xlu0 %769 }
 0x1e5   : > { %v773_v14 = vsel %vm771_vm0, %v768_v12, %v770_v13 }
 0x1e6   : > { %994 = vmatpush3.bf16.msra.mxu1 %v773_v14 }
 0x1e7   : > { %995 = vmatprep.subr.bf16.mxu1 %v1196_v22 }
 0x1ec   : > { %v764_v15 = vpop.permute.xlu1 %763  ;;  %v766_v16 = vpop.permute.xlu0 %765 }
 0x1ed   : > { %v772_v17 = vsel %vm771_vm0, %v764_v15, %v766_v16 }
 0x1ee   : > { %996 = vmatpush3.bf16.msra.mxu1 %v772_v17 }
 0x1f1   : > { %998 = vmatmul.mubr.msk.bf16.vlgmr.msra.gmra.mxu1 %vm776_vm1, %v1082_v18 }
 0x1f9   : > { %v747_v19 = vpop.permute.xlu1 %746  ;;  %v752_v23 = vpop.permute.xlu0 %751 }
 0x2b1   : > { %v814_v20 = vpop.f32.mrf.mxu1 }
 0x2b2   : > { %v815_v21 = vadd.f32 %v814_v20, %v747_v19 }
 0x2b3   : > { %v999_v22 = vpop.f32.mrf.mxu1 }
 0x2b4   : > { %821 = vst [vmem:[%s380_s26] sm:$0xff] %v815_v21 }
 0x2b5   : > { %v817_v24 = vpop.f32.mrf.mxu1 }
 0x2b6   : > { %1096 = shalt.err (!%p1093_p5)
}
 0x2b7   : > { %s1097_s1 = scalar_lea.hbm %s1400_s11, 128  ;;  %s1101_s30 = scalar_lea.hbm %s1486_s9, 256 }
 0x2b8   : > { %p1098_p6 = scmp.ne.s32.totalorder %s1400_s11, %s1097_s1  ;;  %p1102_p10 = scmp.lt.s32.totalorder %s1400_s11, %s1486_s9 }
 0x2b9   : > { %p1103_p11 = scmp.lt.s32.totalorder %s1101_s30, %s1097_s1 }
 0x2ba   : > { %p1099_p7 = pnand %p1098_p6, %p1302_p4 }
 0x2bb   : > { %p1104_p12 = por %p1103_p11, %p1102_p10 }
 0x2bc   : > { %p1100_p9 = pneg %p1099_p7 }
 0x2be   : > { %p1105_p13 = pnand %p1104_p12, %p1100_p9 }
 0x2c0   : > { %1108 = shalt.err (!%p1105_p13)
}
 0x2c1   : > { %1002 = dma.vmem_to_hbm [thread:$0]  (%p1302_p4), %s1402_s29, 128, %s1400_s11, %s824_s15   ;;  %v818_v25 = vadd.f32 %v817_v24, %v752_v23  ;;  %v1000_v26 = vpop.f32.mrf.mxu1 }
 0x2c2   : > { %s1495_s24 = sshll.u32 %s1181_s20, 7  ;;  %s1496_s3 = sshll.u32 %s1404_s13, 4  ;;  %s858_s3 = int_to_ptr.vmem [resolvable:$true] %s1496_s3 }
 0x2c3   : > { %s1433_s2 = scalar_lea.hbm %s1487_s10, %s1495_s24  ;;  %822 = vst [vmem:[%s1404_s13] sm:$0xff] %v818_v25  ;;  %s829_s12 = scalar_lea.sflag [#allocation8], %s1391_s0 }
 0x2c4   : > { %s1109_s1 = scalar_lea.vmem %s858_s3, 128  ;;  %s1200_s26 = smov [#allocation7]  }
 0x2c5   : > { %p1110_p0 = scmp.ne.s32.totalorder %s858_s3, %s1109_s1  ;;  %s1113_s30 = sshll.u32 %s1200_s26, 4  ;;  %s1114_s30 = int_to_ptr.vmem [resolvable:$false] %s1113_s30 }
 0x2c6   : > { %s1115_s29 = scalar_lea.vmem %s1114_s30, 256  ;;  %p1116_p3 = scmp.lt.s32.totalorder %s858_s3, %s1114_s30 }
 0x2c7   : > { %p1111_p1 = pnand %p1110_p0, %p1302_p4  ;;  %p1117_p5 = scmp.lt.s32.totalorder %s1115_s29, %s1109_s1 }
 0x2c9   : > { %p1112_p2 = pneg %p1111_p1  ;;  %p1118_p6 = por %p1117_p5, %p1116_p3 }
 0x2cb   : > { %p1119_p7 = pnand %p1118_p6, %p1112_p2 }
 0x2cd   : > { %1122 = shalt.err (!%p1119_p7)
}
 0x2ce   : > { %s1123_s20 = scalar_lea.hbm %s1433_s2, 128  ;;  %s1127_s13 = scalar_lea.hbm %s1487_s10, 256 }
 0x2cf   : > { %p1124_p9 = scmp.ne.s32.totalorder %s1433_s2, %s1123_s20  ;;  %p1128_p12 = scmp.lt.s32.totalorder %s1433_s2, %s1487_s10 }
 0x2d0   : > { %p1129_p13 = scmp.lt.s32.totalorder %s1127_s13, %s1123_s20 }
 0x2d1   : > { %p1125_p10 = pnand %p1124_p9, %p1302_p4 }
 0x2d2   : > { %p1130_p0 = por %p1129_p13, %p1128_p12 }
 0x2d3   : > { %p1126_p11 = pneg %p1125_p10 }
 0x2d5   : > { %p1131_p1 = pnand %p1130_p0, %p1126_p11 }
 0x2d7   : > { %1134 = shalt.err (!%p1131_p1)
}
 0x2d8   : > { %1003 = dma.vmem_to_hbm [thread:$0]  (%p1302_p4), %s858_s3, 128, %s1433_s2, %s829_s12  }
 0x2d9 PF: > { %p1013_p2 = scmp.ge.s32.totalorder %s1189_s22, 2  ;;  %s869_s14 = sand.u32 1, %s1169_s17  }
 0x2da   : > { %s870_s16 = scalar_lea.sflag [#allocation6], %s869_s14 }
 0x2db   : > { %p1007_p3 = pnand %p1013_p2, %p1309_p8 }
 0x2dd   : > { %p1008_p5 = pneg %p1007_p3 }
 0x2df   : > { %1160 = dma.done.wait (%p1008_p5), %s870_s16, 128  }
 0x2e0   : > { %1162 = vsyncadd (%p1008_p5), %s870_s16, 4294967168  ;;  %s879_s1 = scalar_lea.sflag [#allocation8], %s869_s14 }
 0x2e1   : > { %1164 = dma.done.wait (%p1008_p5), %s879_s1, 128  }
 0x2e2   : > { %1166 = vsyncadd (%p1008_p5), %s879_s1, 4294967168  ;;  %s29_s22 = sadd.s32 1, %s1189_s22   ;;  %s1497_s17 = smov %s1173_s18 }
 0x2e3   : > { %p26_p6 = scmp.ge.s32.totalorder %s29_s22, 4   ;;  %s1498_s18 = smov %s1177_s19 }
 0x2e4   : > { %s1499_s19 = smov %s1315_s28  ;;  %s1500_s20 = smov %s1185_s21 }
 0x2e5   : > { %s1501_s21 = smov %s1503_s23  ;;  %28 = sbr.rel (!%p26_p6) target bundleno = 11 (0xb), region = 112 }
 0x2ea   :  { %884 = vsyncpa [#allocation6], 1 }
 0x2eb   :  { %886 = vsyncpa [#allocation6 + $0x1], 1 }
 0x2ec   :  { %887 = vsyncpa [#allocation8], 1 }
 0x2ed   :  { %889 = vsyncpa [#allocation8 + $0x1], 1 }

</bundles_post_ra>
